<compile_context>
chip_gen: v7x
topology: tpu7x:2x2x1
jax: 0.10.0
libtpu: 0.0.40
codegen_flags: <defaults>
</compile_context>

<pallas_src>
import functools

import jax
import jax.numpy as jnp
from jax.experimental import pallas as pl
from jax.experimental.pallas import tpu as pltpu

EPS = 1e-5
_VMEM_LIMIT = 48 * 1024 * 1024


# ----------------------------- Pallas kernels ------------------------------
def _mm_bn_kernel(x_ref, w_ref, s_ref, b_ref, o_ref, *, act):
    """bf16 MXU matmul with fused folded-BN scale/bias (+ReLU6)."""
    y = jnp.dot(x_ref[...], w_ref[...], preferred_element_type=jnp.float32)
    y = y * s_ref[...] + b_ref[...]
    if act:
        y = jnp.clip(y, 0.0, 6.0)
    o_ref[...] = y


def _block_kernel(*refs, H, W, stride, has_expand, residual):
    """Fused MobileNetV2 inverted-residual block for ONE batch element.

    expand(1x1, BN, ReLU6) -> depthwise 3x3 (stride 1/2, BN, ReLU6)
    -> project(1x1, BN) [+ residual].  The expanded activation only exists in
    VMEM.  Stride-2 inputs arrive as 4 spatial parity planes so all taps are
    unit-stride slices.
    """
    if has_expand:
        (x_ref, we_ref, es_ref, eb_ref,
         wd_ref, ds_ref, db_ref, wp_ref, ps_ref, pb_ref,
         o_ref, pad_ref, flat_ref) = refs
    else:
        (x_ref, wd_ref, ds_ref, db_ref, wp_ref, ps_ref, pb_ref,
         o_ref, pad_ref, flat_ref) = refs

    hidden = wd_ref.shape[1]
    if stride == 1:
        Ho, Wo = H, W
    else:
        Ho, Wo = H // 2, W // 2

    # Zero the padded scratch (1px halo); interior is rewritten below.
    pad_ref[...] = jnp.zeros(pad_ref.shape, pad_ref.dtype)

    x = x_ref[0]                                    # (M_in, Cin) f32

    # ---- expand: 1x1 conv on the MXU in bf16, f32 BN + ReLU6 epilogue ----
    if has_expand:
        ex = jnp.dot(x.astype(jnp.bfloat16), we_ref[...],
                     preferred_element_type=jnp.float32)
        ex = jnp.clip(ex * es_ref[...] + eb_ref[...], 0.0, 6.0)
    else:
        ex = x                                      # t == 1 block

    # ---- scatter the expanded rows into the zero-padded VMEM scratch ----
    if stride == 1:
        # pad_ref: (H+2, W+2, hidden)
        for r in range(H):
            pad_ref[1 + r, 1:1 + W, :] = ex[r * W:(r + 1) * W, :]
    else:
        # pad_ref: (4, Ho+1, Wo+1, hidden); planes [ee, eo, oe, oo],
        # zero pad on top row / left column only (that is all stride-2 needs).
        for p in range(4):
            for r in range(Ho):
                row0 = (p * Ho + r) * Wo
                pad_ref[p, 1 + r, 1:1 + Wo, :] = ex[row0:row0 + Wo, :]

    # ---- depthwise 3x3 + BN + ReLU6 (VPU, f32 accumulate) ----
    wd = wd_ref[...]                                # (9, hidden)
    ds = ds_ref[0]
    db = db_ref[0]
    acc = jnp.zeros((Ho, Wo, hidden), jnp.float32)
    if stride == 1:
        sp = pad_ref[...]                           # (H+2, W+2, hidden)
        for kw in range(3):                         # one W-shift per kw,
            col = sp[:, kw:kw + W, :]               # reused for all kh
            for kh in range(3):
                acc = acc + col[kh:kh + H] * wd[kh * 3 + kw]
    else:
        planes = [pad_ref[p] for p in range(4)]     # each (Ho+1, Wo+1, hidden)
        for kh in range(3):
            for kw in range(3):
                p = 2 * (kh != 1) + (kw != 1)       # parity plane for this tap
                ro = 0 if kh == 0 else 1
                co = 0 if kw == 0 else 1
                acc = acc + planes[p][ro:ro + Ho, co:co + Wo, :] * wd[kh * 3 + kw]
    dw = jnp.clip(acc * ds + db, 0.0, 6.0).astype(jnp.bfloat16)

    # ---- bridge spatial (Ho, Wo, hidden) -> (Ho*Wo, hidden) via scratch ----
    for r in range(Ho):
        flat_ref[r * Wo:(r + 1) * Wo, :] = dw[r]

    # ---- project: 1x1 conv on the MXU in bf16, linear BN (+ residual) ----
    y = jnp.dot(flat_ref[...], wp_ref[...], preferred_element_type=jnp.float32)
    y = y * ps_ref[...] + pb_ref[...]
    if residual:
        y = y + x
    o_ref[0] = y


# ------------------------------ kernel wrappers -----------------------------
def _row_tile(M):
    if M <= 8:
        return M
    # at least two row tiles so both v7x TensorCores get work; cap at 512 rows
    half = (((M + 1) // 2) + 7) // 8 * 8
    return max(8, min(512, half))


def matmul_bn_act(x2d, w_bf16, scale, bias, act):
    """(M,K)x(K,N) bf16 MXU matmul with fused folded-BN scale/bias, ReLU6."""
    M, K = x2d.shape
    N = w_bf16.shape[1]
    TM = _row_tile(M)
    Mp = pl.cdiv(M, TM) * TM
    xb = x2d.astype(jnp.bfloat16)
    if Mp != M:
        xb = jnp.pad(xb, ((0, Mp - M), (0, 0)))
    s2 = scale.reshape(1, N)
    b2 = bias.reshape(1, N)
    out = pl.pallas_call(
        functools.partial(_mm_bn_kernel, act=act),
        out_shape=jax.ShapeDtypeStruct((Mp, N), jnp.float32),
        grid=(Mp // TM,),
        in_specs=[
            pl.BlockSpec((TM, K), lambda i: (i, 0)),
            pl.BlockSpec((K, N), lambda i: (0, 0)),
            pl.BlockSpec((1, N), lambda i: (0, 0)),
            pl.BlockSpec((1, N), lambda i: (0, 0)),
        ],
        out_specs=pl.BlockSpec((TM, N), lambda i: (i, 0)),
        compiler_params=pltpu.CompilerParams(
            dimension_semantics=("parallel",),
            vmem_limit_bytes=_VMEM_LIMIT),
    )(xb, w_bf16, s2, b2)
    return out[:M]


def _parity_flat(x):
    """(B, H, W, C) with even H, W -> (B, 4*(H//2)*(W//2), C).

    Row layout is plane-major / row-major:  ((p*Ho + i)*Wo + j).
    Planes are [even-row/even-col, even/odd, odd/even, odd/odd].
    XLA glue on the narrow (un-expanded) tensor - same bytes as reading x.
    """
    B, H, W, C = x.shape
    assert H % 2 == 0 and W % 2 == 0, "stride-2 block needs even H, W"
    ee = x[:, 0::2, 0::2, :]
    eo = x[:, 0::2, 1::2, :]
    oe = x[:, 1::2, 0::2, :]
    oo = x[:, 1::2, 1::2, :]
    p = jnp.stack([ee, eo, oe, oo], axis=1)
    return p.reshape(B, 4 * (H // 2) * (W // 2), C)


def inverted_residual(x_flat, H, W, blk):
    """x_flat: (B, H*W, Cin) f32 -> (B, Ho*Wo, Cout) f32 (single pallas_call)."""
    B, _, Cin = x_flat.shape
    stride = blk["stride"]
    hidden = blk["hidden"]
    Cout = blk["cout"]
    has_expand = "expand" in blk
    residual = blk["residual"]

    if stride == 1:
        Ho, Wo = H, W
        x_in = x_flat
        pad_shape = (H + 2, W + 2, hidden)
    else:
        Ho, Wo = H // 2, W // 2
        x_in = _parity_flat(x_flat.reshape(B, H, W, Cin))
        pad_shape = (4, Ho + 1, Wo + 1, hidden)

    M_in = x_in.shape[1]
    M_out = Ho * Wo

    in_specs = [pl.BlockSpec((1, M_in, Cin), lambda b: (b, 0, 0))]
    args = [x_in]
    if has_expand:
        we, es, eb = blk["expand"]
        in_specs += [pl.BlockSpec((Cin, hidden), lambda b: (0, 0)),
                     pl.BlockSpec((1, hidden), lambda b: (0, 0)),
                     pl.BlockSpec((1, hidden), lambda b: (0, 0))]
        args += [we, es.reshape(1, hidden), eb.reshape(1, hidden)]
    wd, ds, db = blk["dw"]
    wp, ps, pb = blk["project"]
    in_specs += [pl.BlockSpec((9, hidden), lambda b: (0, 0)),
                 pl.BlockSpec((1, hidden), lambda b: (0, 0)),
                 pl.BlockSpec((1, hidden), lambda b: (0, 0)),
                 pl.BlockSpec((hidden, Cout), lambda b: (0, 0)),
                 pl.BlockSpec((1, Cout), lambda b: (0, 0)),
                 pl.BlockSpec((1, Cout), lambda b: (0, 0))]
    args += [wd, ds.reshape(1, hidden), db.reshape(1, hidden),
             wp, ps.reshape(1, Cout), pb.reshape(1, Cout)]

    kernel = functools.partial(_block_kernel, H=H, W=W, stride=stride,
                               has_expand=has_expand, residual=residual)

    out = pl.pallas_call(
        kernel,
        out_shape=jax.ShapeDtypeStruct((B, M_out, Cout), jnp.float32),
        grid=(B,),
        in_specs=in_specs,
        out_specs=pl.BlockSpec((1, M_out, Cout), lambda b: (b, 0, 0)),
        scratch_shapes=[
            pltpu.VMEM(pad_shape, jnp.float32),          # padded expanded act
            pltpu.VMEM((M_out, hidden), jnp.bfloat16),   # flat depthwise out
        ],
        compiler_params=pltpu.CompilerParams(
            dimension_semantics=("parallel",),
            vmem_limit_bytes=_VMEM_LIMIT),
    )(*args)
    return out, Ho, Wo


def im2col_3x3_s2(x):
    """3x3 / stride-2 / pad-1 patches; returns (B*Ho*Wo, 9*Cin), Ho, Wo."""
    B, H, W, Cin = x.shape
    Ho = (H - 1) // 2 + 1
    Wo = (W - 1) // 2 + 1
    xp = jnp.pad(x, ((0, 0), (1, 1), (1, 1), (0, 0)))
    cols = [xp[:, kh:kh + 2 * Ho - 1:2, kw:kw + 2 * Wo - 1:2, :]
            for kh in range(3) for kw in range(3)]
    patches = jnp.concatenate(cols, axis=-1)          # (B, Ho, Wo, 27)
    return patches.reshape(B * Ho * Wo, 9 * Cin), Ho, Wo


# ------------------------------- parameters ---------------------------------
# MobileNetV2 inverted-residual config: (expand_ratio, out_channels, stride)
_CFG = [
    (1, 16, 1),
    (6, 24, 2), (6, 24, 1),
    (6, 32, 2), (6, 32, 1), (6, 32, 1),
    (6, 64, 2), (6, 64, 1), (6, 64, 1), (6, 64, 1),
    (6, 96, 1), (6, 96, 1), (6, 96, 1),
    (6, 160, 2), (6, 160, 1), (6, 160, 1),
    (6, 320, 1),
]
# low_feature = features[:5] = stem + blocks[0:4]; high_feature = blocks[4:] + head
_LOW_SPLIT = 4


def _fold_bn(key, c):
    kg, kb, km, kv = jax.random.split(key, 4)
    gamma = jax.random.uniform(kg, (c,), minval=0.5, maxval=1.5)
    beta = 0.1 * jax.random.normal(kb, (c,))
    mean = 0.1 * jax.random.normal(km, (c,))
    var = jax.random.uniform(kv, (c,), minval=0.5, maxval=1.5)
    scale = gamma / jnp.sqrt(var + EPS)
    bias = beta - mean * scale
    return scale.astype(jnp.float32), bias.astype(jnp.float32)


def build_params(key):
    keys = list(jax.random.split(key, 256))
    it = iter(keys)
    params = {}

    # stem: Conv2d(3, 32, k=3, s=2, p=1) + BN + ReLU6
    w = jax.random.normal(next(it), (3, 3, 3, 32), jnp.float32) * (2.0 / 27.0) ** 0.5
    s, b = _fold_bn(next(it), 32)
    params["stem"] = (w.reshape(27, 32).astype(jnp.bfloat16), s, b)

    blocks = []
    cin = 32
    for (t, cout, stride) in _CFG:
        hidden = cin * t
        blk = {"stride": stride, "cout": cout, "hidden": hidden,
               "residual": (stride == 1 and cin == cout)}
        if t != 1:
            w = jax.random.normal(next(it), (cin, hidden), jnp.float32) * (1.0 / cin) ** 0.5
            s, b = _fold_bn(next(it), hidden)
            blk["expand"] = (w.astype(jnp.bfloat16), s, b)
        wd = jax.random.normal(next(it), (3, 3, hidden), jnp.float32) * (2.0 / 9.0) ** 0.5
        s, b = _fold_bn(next(it), hidden)
        blk["dw"] = (wd.reshape(9, hidden), s, b)              # f32 (VPU path)
        wp = jax.random.normal(next(it), (hidden, cout), jnp.float32) * (1.0 / hidden) ** 0.5
        s, b = _fold_bn(next(it), cout)
        blk["project"] = (wp.astype(jnp.bfloat16), s, b)
        blocks.append(blk)
        cin = cout
    params["blocks"] = blocks

    # head: Conv2d(320, 1280, k=1) + BN + ReLU6  (features[18])
    w = jax.random.normal(next(it), (320, 1280), jnp.float32) * (1.0 / 320.0) ** 0.5
    s, b = _fold_bn(next(it), 1280)
    params["head"] = (w.astype(jnp.bfloat16), s, b)
    return params


# -------------------------------- forward -----------------------------------
def encoder_forward(x_nchw, params):
    """Returns (out1, out2) in NCHW, matching MobileNetV2_encoder.forward."""
    x = jnp.transpose(x_nchw, (0, 2, 3, 1)).astype(jnp.float32)  # NCHW -> NHWC
    B = x.shape[0]

    # stem (features[0]): im2col (XLA glue) + fused bf16 matmul/BN/ReLU6 kernel
    patches, H, W = im2col_3x3_s2(x)
    w, s, b = params["stem"]
    y = matmul_bn_act(patches, w, s, b, act=True).reshape(B, H * W, 32)

    out1 = None
    for idx, blk in enumerate(params["blocks"]):
        y, H, W = inverted_residual(y, H, W, blk)
        if idx == _LOW_SPLIT - 1:
            out1 = y.reshape(B, H, W, y.shape[-1])   # features[:5] output

    # head (features[18]): 1x1 conv 320 -> 1280 + BN + ReLU6
    w, s, b = params["head"]
    Cf = y.shape[-1]
    y2 = matmul_bn_act(y.reshape(B * H * W, Cf), w, s, b, act=True)
    out2 = y2.reshape(B, H, W, 1280)                 # features[5:] output

    return (jnp.transpose(out1, (0, 3, 1, 2)),
            jnp.transpose(out2, (0, 3, 1, 2)))


# --------------------------------- main --------------------------------------
if __name__ == "__main__":
    root = jax.random.PRNGKey(0)
    k_param, k_input = jax.random.split(root)
    params = build_params(k_param)

    # small deterministic input (PyTorch NCHW convention, 3 input channels)
    x = jax.random.normal(k_input, (2, 3, 32, 32), jnp.float32)

    out1, out2 = encoder_forward(x, params)
    out1 = jax.block_until_ready(out1)
    out2 = jax.block_until_ready(out2)

    assert out1.shape == (2, 32, 4, 4), out1.shape      # stride-8, 32 channels
    assert out2.shape == (2, 1280, 1, 1), out2.shape    # stride-32, 1280 channels
    assert bool(jnp.all(jnp.isfinite(out1))) and bool(jnp.all(jnp.isfinite(out2)))

    print("KERNEL_OK")
</pallas_src>

<mosaic_0001>
module attributes {stable_mosaic.version = 11 : i64} {
  func.func @_mm_bn_kernel(%arg0: i32, %arg1: memref<256x27xbf16, #tpu.memory_space<vmem>>, %arg2: memref<27x32xbf16, #tpu.memory_space<vmem>>, %arg3: memref<1x32xf32, #tpu.memory_space<vmem>>, %arg4: memref<1x32xf32, #tpu.memory_space<vmem>>, %arg5: memref<256x32xf32, #tpu.memory_space<vmem>>) attributes {dimension_semantics = [#tpu.dimension_semantics<parallel>], iteration_bounds = array<i64: 2>, scalar_prefetch = 0 : i64, scratch_operands = 0 : i64, tpu.core_type = #tpu.core_type<tc>, window_params = [{transform_indices = @transform_0, window_bounds = array<i64: 256, 27>}, {pipeline_mode = #tpu.pipeline_mode<synchronous>, transform_indices = @transform_1, window_bounds = array<i64: 27, 32>}, {pipeline_mode = #tpu.pipeline_mode<synchronous>, transform_indices = @transform_2, window_bounds = array<i64: 1, 32>}, {pipeline_mode = #tpu.pipeline_mode<synchronous>, transform_indices = @transform_3, window_bounds = array<i64: 1, 32>}, {transform_indices = @transform_4, window_bounds = array<i64: 256, 32>}]} {
    %c0 = arith.constant 0 : index
    %c0_0 = arith.constant 0 : index
    %0 = vector.load %arg1[%c0, %c0_0] : memref<256x27xbf16, #tpu.memory_space<vmem>>, vector<256x27xbf16>
    %c0_1 = arith.constant 0 : index
    %c0_2 = arith.constant 0 : index
    %1 = vector.load %arg2[%c0_1, %c0_2] : memref<27x32xbf16, #tpu.memory_space<vmem>>, vector<27x32xbf16>
    %cst = arith.constant dense<0.000000e+00> : vector<256x32xf32>
    %2 = tpu.matmul %0, %1, %cst {dimension_numbers = #tpu.dot_dimension_numbers<[1], [0], [0], [1], [0, 0, 1, 1], [], []>} : vector<256x27xbf16>, vector<27x32xbf16>, vector<256x32xf32> -> vector<256x32xf32>
    %c0_3 = arith.constant 0 : index
    %c0_4 = arith.constant 0 : index
    %3 = vector.load %arg3[%c0_3, %c0_4] : memref<1x32xf32, #tpu.memory_space<vmem>>, vector<1x32xf32>
    %4 = vector.broadcast %3 : vector<1x32xf32> to vector<256x32xf32>
    %5 = arith.mulf %2, %4 : vector<256x32xf32>
    %c0_5 = arith.constant 0 : index
    %c0_6 = arith.constant 0 : index
    %6 = vector.load %arg4[%c0_5, %c0_6] : memref<1x32xf32, #tpu.memory_space<vmem>>, vector<1x32xf32>
    %7 = vector.broadcast %6 : vector<1x32xf32> to vector<256x32xf32>
    %8 = arith.addf %5, %7 : vector<256x32xf32>
    %cst_7 = arith.constant 0.000000e+00 : f32
    %cst_8 = arith.constant 6.000000e+00 : f32
    %9 = vector.broadcast %cst_7 : f32 to vector<256x32xf32>
    %10 = arith.maximumf %9, %8 : vector<256x32xf32>
    %11 = vector.broadcast %cst_8 : f32 to vector<256x32xf32>
    %12 = arith.minimumf %11, %10 : vector<256x32xf32>
    %c0_9 = arith.constant 0 : index
    %c0_10 = arith.constant 0 : index
    %13 = vector.load %arg5[%c0_9, %c0_10] : memref<256x32xf32, #tpu.memory_space<vmem>>, vector<256x32xf32>
    tpu.vector_store %arg5[%c0_9, %c0_10], %12 {strides = array<i32>} : memref<256x32xf32, #tpu.memory_space<vmem>>, vector<256x32xf32>,
    return
  }
  func.func @transform_0(%arg0: i32) -> (i32, i32) {
    %c0_i32 = arith.constant 0 : i32
    %c0_i32_0 = arith.constant 0 : i32
    return %arg0, %c0_i32 : i32, i32
  }
  func.func @transform_1(%arg0: i32) -> (i32, i32) {
    %c0_i32 = arith.constant 0 : i32
    %c0_i32_0 = arith.constant 0 : i32
    %c0_i32_1 = arith.constant 0 : i32
    return %c0_i32, %c0_i32_0 : i32, i32
  }
  func.func @transform_2(%arg0: i32) -> (i32, i32) {
    %c0_i32 = arith.constant 0 : i32
    %c0_i32_0 = arith.constant 0 : i32
    %c0_i32_1 = arith.constant 0 : i32
    return %c0_i32, %c0_i32_0 : i32, i32
  }
  func.func @transform_3(%arg0: i32) -> (i32, i32) {
    %c0_i32 = arith.constant 0 : i32
    %c0_i32_0 = arith.constant 0 : i32
    %c0_i32_1 = arith.constant 0 : i32
    return %c0_i32, %c0_i32_0 : i32, i32
  }
  func.func @transform_4(%arg0: i32) -> (i32, i32) {
    %c0_i32 = arith.constant 0 : i32
    %c0_i32_0 = arith.constant 0 : i32
    return %arg0, %c0_i32 : i32, i32
  }
}

</mosaic_0001>

<bundles_post_ra>
// kernel: tpu_custom_call.1
= control target key start
LH: loop header
LB: loop body
LE: loop exit
PB: predicated region body
PF: predicated region fallthrough
CT: control target
= control target key end

     0   :  { %s943_s15 = smov 0   ;;  %s1144_s0 = inlined_call_operand.vmem [shape: bf16[512,27], index: 0, kind: input, shape index: {}]   ;;  %s1145_s1 = inlined_call_operand.vmem [shape: bf16[27,32], index: 1, kind: input, shape index: {}]   ;;  %s1146_s2 = inlined_call_operand.vmem [shape: f32[1,32], index: 2, kind: input, shape index: {}]   ;;  %s1147_s3 = inlined_call_operand.vmem [shape: f32[1,32], index: 3, kind: input, shape index: {}]   ;;  %s1148_s4 = inlined_call_operand.vmem [shape: f32[512,32], index: 4, kind: output, shape index: {}]  }
   0x1 LB: > { %s777_s16 = sadd.s32 4294967295, %s915_s15   ;;  %p781_p0 = scmp.ge.s32.totalorder %s915_s15, 1  ;;  %s915_s15 = sphi %s943_s15, %s14_s15  }
   0x2   : > { %p163_p1 = scmp.lt.s32.totalorder %s915_s15, 3 }
   0x4   : > { %p164_p2 = pnand %p781_p0, %p163_p1 }
   0x5   : > { %v891_v0 = vld [vmem:[%s1145_s1] sm:$0xff] (!%p164_p2)   ;;  %vm378_vm0 = vcmask (!%p164_p2), 1044480   ;;  %v892_v1 = vld [vmem:[%s1145_s1 + $0x8] sm:$0x3f] (!%p164_p2)   ;;  %vm379_vm1 = vcmask (!%p164_p2), 1045504   ;;  %s782_s21 = sshll.u32 (!%p164_p2), %s777_s16, 5 }
   0x6   : > { %167 = sbr.rel (%p164_p2) target bundleno = 268 (0x10c), region = 36  ;;  %842 = vmatprep.subr.bf16.mxu0 (!%p164_p2), %v891_v0  ;;  %878 = vmatprep.subr.bf16.mxu1 (!%p164_p2), %v891_v0  ;;  %v917_v2 = vmov (!%p164_p2), 65535   ;;  %p190_p3 = scmp.lt.s32.totalorder (!%p164_p2), %s782_s21, 63  ;;  %vm329_vm2 = vcmask (!%p164_p2), 220160   ;;  %v1000_v22 = vld [vmem:[%s1146_s2] ss:$0 sm:$0xff] (!%p164_p2) }
   0x7   : > { %843 = vmatpush3.bf16.msra.mxu0 (!%p164_p2), %v891_v0  ;;  %880 = vmatpush3.bf16.msra.mxu1 (!%p164_p2), %v891_v0  ;;  %v380_v3 = vsel (!%p164_p2), %vm378_vm0, 4294967295, %v917_v2  ;;  %v1005_v24 = vld [vmem:[%s1147_s3] ss:$0 sm:$0xff] (!%p164_p2)  ;;  %vm688_vm3 = vcmask (!%p164_p2), 261120  }
   0x8   : > { %v381_v4 = vsel (!%p164_p2), %vm379_vm1, %v380_v3, 0 }
   0x9   : > { %v383_v5 = vand.u32 (!%p164_p2), %v892_v1, %v381_v4 }
   0xb   : > { %844 = vmatprep.subr.bf16.mxu0 (!%p164_p2), %v383_v5  ;;  %879 = vmatprep.subr.bf16.mxu1 (!%p164_p2), %v383_v5 }
   0xc   : > { %845 = vmatpush3.bf16.msra.mxu0 (!%p164_p2), %v383_v5  ;;  %881 = vmatpush3.bf16.msra.mxu1 (!%p164_p2), %v383_v5 }
   0xd   : > { %s1150_s21 = smov (!%p190_p3, %s782_s21), 63 }
   0xe   : > { %s783_s22 = sshll.u32 %s1150_s21, 2  ;;  %s785_s30 = sshll.u32 %s1150_s21, 3 }
   0xf   : > { %s963_s25 = scalar_lea.vmem %s1144_s0, %s783_s22  ;;  %s1024_s7 = scalar_lea.vmem %s1148_s4, %s785_s30 }
  0x10   : > { %v893_v6 = vld [vmem:[%s963_s25] sm:$0xff]   ;;  %v895_v8 = vld [vmem:[%s963_s25 + $0x8] sm:$0xff]   ;;  %v897_v10 = vld [vmem:[%s963_s25 + $0x10] sm:$0xff]  }
  0x11   : > { %v894_v7 = vld [vmem:[%s963_s25 + $0x40] sm:$0xff]   ;;  %846 = vmatprep.mubr.msk.bf16.mxu0 %vm329_vm2, %v893_v6  ;;  %v896_v9 = vld [vmem:[%s963_s25 + $0x48] sm:$0xff]   ;;  %v898_v11 = vld [vmem:[%s963_s25 + $0x50] sm:$0xff]  }
  0x12   : > { %862 = vmatprep.mubr.msk.bf16.mxu1 %vm329_vm2, %v894_v7  ;;  %847 = vmatmul.mubr.msk.bf16.vlgmr.msra.gmra.mrb[0].mxu0 %vm329_vm2, %v895_v8  ;;  %v899_v12 = vld [vmem:[%s963_s25 + $0x18] sm:$0xff]   ;;  %v901_v14 = vld [vmem:[%s963_s25 + $0x20] sm:$0xff]   ;;  %v903_v16 = vld [vmem:[%s963_s25 + $0x28] sm:$0xff]  }
  0x13   : > { %863 = vmatmul.mubr.msk.bf16.vlgmr.msra.gmra.mrb[0].mxu1 %vm329_vm2, %v896_v9  ;;  %850 = vmatprep.mubr.msk.bf16.mxu0 %vm329_vm2, %v897_v10  ;;  %v900_v13 = vld [vmem:[%s963_s25 + $0x58] sm:$0xff]   ;;  %v902_v15 = vld [vmem:[%s963_s25 + $0x60] sm:$0xff]   ;;  %v904_v17 = vld [vmem:[%s963_s25 + $0x68] sm:$0xff]  }
  0x14   : > { %866 = vmatprep.mubr.msk.bf16.mxu1 %vm329_vm2, %v898_v11  ;;  %v905_v18 = vld [vmem:[%s963_s25 + $0x30] sm:$0xff]   ;;  %v907_v20 = vld [vmem:[%s963_s25 + $0x38] sm:$0xff]  }
  0x15   : > { %v906_v19 = vld [vmem:[%s963_s25 + $0x70] sm:$0xff]   ;;  %v908_v21 = vld [vmem:[%s963_s25 + $0x78] sm:$0xff]  }
  0x1a   : > { %851 = vmatmul.mubr.msk.bf16.gmra.mrb[4].mxu0 %vm329_vm2, %v899_v12 }
  0x1b   : > { %867 = vmatmul.mubr.msk.bf16.gmra.mrb[4].mxu1 %vm329_vm2, %v900_v13  ;;  %854 = vmatprep.mubr.msk.bf16.mxu0 %vm329_vm2, %v901_v14 }
  0x1c   : > { %870 = vmatprep.mubr.msk.bf16.mxu1 %vm329_vm2, %v902_v15 }
  0x22   : > { %855 = vmatmul.mubr.msk.bf16.gmra.mrb[8].mxu0 %vm329_vm2, %v903_v16 }
  0x23   : > { %871 = vmatmul.mubr.msk.bf16.gmra.mrb[8].mxu1 %vm329_vm2, %v904_v17  ;;  %858 = vmatprep.mubr.msk.bf16.mxu0 %vm329_vm2, %v905_v18 }
  0x24   : > { %874 = vmatprep.mubr.msk.bf16.mxu1 %vm329_vm2, %v906_v19 }
  0x2a   : > { %859 = vmatmul.mubr.msk.bf16.gmra.mrb[12].mxu0 %vm329_vm2, %v907_v20 }
  0x2b   : > { %875 = vmatmul.mubr.msk.bf16.gmra.mrb[12].mxu1 %vm329_vm2, %v908_v21 }
  0xe5   : > { %v848_v23 = vpop.f32.mrb[0].mxu0 }
  0xe6   : > { %v555_v25 = vmul.f32 %v848_v23, %v1000_v22  ;;  %v864_v26 = vpop.f32.mrb[0].mxu1  ;;  %v419_v27 = vpop.f32.mrb[1].mxu0 }
  0xe7   : > { %v571_v28 = vmul.f32 %v864_v26, %v1000_v22  ;;  %v553_v29 = vmul.f32 %v1000_v22, %v419_v27  ;;  %v483_v30 = vpop.f32.mrb[1].mxu1  ;;  %v849_v31 = vpop.f32.mrb[2].mxu0 }
  0xe8   : > { %v594_v32 = vadd.f32 %v1005_v24, %v555_v25  ;;  %v569_v33 = vmul.f32 %v1000_v22, %v483_v30  ;;  %v556_v34 = vmul.f32 %v849_v31, %v1000_v22  ;;  %v865_v35 = vpop.f32.mrb[2].mxu1  ;;  %v422_v36 = vpop.f32.mrb[3].mxu0 }
  0xe9   : > { %v610_v37 = vadd.f32 %v1005_v24, %v571_v28  ;;  %v592_v38 = vadd.f32 %v1005_v24, %v553_v29  ;;  %v572_v39 = vmul.f32 %v865_v35, %v1000_v22  ;;  %v554_v40 = vmul.f32 %v1000_v22, %v422_v36  ;;  %v486_v41 = vpop.f32.mrb[3].mxu1 }
  0xea   : > { %v626_v42 = vmax.f32 %v594_v32, 0.0  ;;  %v608_v43 = vadd.f32 %v1005_v24, %v569_v33  ;;  %v595_v44 = vadd.f32 %v1005_v24, %v556_v34  ;;  %v570_v45 = vmul.f32 %v1000_v22, %v486_v41 }
  0xeb   : > { %v642_v46 = vmax.f32 %v610_v37, 0.0  ;;  %v624_v47 = vmax.f32 %v592_v38, 0.0  ;;  %v611_v48 = vadd.f32 %v1005_v24, %v572_v39  ;;  %v593_v49 = vadd.f32 %v1005_v24, %v554_v40 }
  0xec   : > { %v658_v50 = vmin.f32 %v626_v42, 6.0  ;;  %v640_v51 = vmax.f32 %v608_v43, 0.0  ;;  %v627_v52 = vmax.f32 %v595_v44, 0.0  ;;  %v609_v53 = vadd.f32 %v1005_v24, %v570_v45 }
  0xed   : > { %v674_v54 = vmin.f32 %v642_v46, 6.0  ;;  %v656_v55 = vmin.f32 %v624_v47, 6.0  ;;  %v643_v56 = vmax.f32 %v611_v48, 0.0  ;;  %v625_v57 = vmax.f32 %v593_v49, 0.0  ;;  %v852_v58 = vpop.f32.mrb[4].mxu0 }
  0xee   : > { %691 = vst.msk [vmem:[%s1024_s7 + $0x10] sm:$0xff] %vm688_vm3, %v658_v50  ;;  %v672_v59 = vmin.f32 %v640_v51, 6.0  ;;  %v659_v60 = vmin.f32 %v627_v52, 6.0  ;;  %v641_v61 = vmax.f32 %v609_v53, 0.0  ;;  %v559_v62 = vmul.f32 %v852_v58, %v1000_v22  ;;  %v868_v63 = vpop.f32.mrb[4].mxu1  ;;  %v435_v0 = vpop.f32.mrb[5].mxu0 }
  0xef   : > { %707 = vst.msk [vmem:[%s1024_s7 + $0x90] sm:$0xff] %vm688_vm3, %v674_v54  ;;  %689 = vst.msk [vmem:[%s1024_s7] sm:$0xff] %vm688_vm3, %v656_v55  ;;  %v675_v1 = vmin.f32 %v643_v56, 6.0  ;;  %v657_v2 = vmin.f32 %v625_v57, 6.0  ;;  %v575_v3 = vmul.f32 %v868_v63, %v1000_v22  ;;  %v557_v4 = vmul.f32 %v1000_v22, %v435_v0  ;;  %v499_v5 = vpop.f32.mrb[5].mxu1  ;;  %v853_v6 = vpop.f32.mrb[6].mxu0 }
  0xf0   : > { %705 = vst.msk [vmem:[%s1024_s7 + $0x80] sm:$0xff] %vm688_vm3, %v672_v59  ;;  %692 = vst.msk [vmem:[%s1024_s7 + $0x18] sm:$0xff] %vm688_vm3, %v659_v60  ;;  %v673_v7 = vmin.f32 %v641_v61, 6.0  ;;  %v598_v8 = vadd.f32 %v1005_v24, %v559_v62  ;;  %v573_v9 = vmul.f32 %v1000_v22, %v499_v5  ;;  %v560_v10 = vmul.f32 %v853_v6, %v1000_v22  ;;  %v869_v11 = vpop.f32.mrb[6].mxu1  ;;  %v438_v12 = vpop.f32.mrb[7].mxu0 }
  0xf1   : > { %708 = vst.msk [vmem:[%s1024_s7 + $0x98] sm:$0xff] %vm688_vm3, %v675_v1  ;;  %690 = vst.msk [vmem:[%s1024_s7 + $0x8] sm:$0xff] %vm688_vm3, %v657_v2  ;;  %v614_v13 = vadd.f32 %v1005_v24, %v575_v3  ;;  %v596_v14 = vadd.f32 %v1005_v24, %v557_v4  ;;  %v576_v15 = vmul.f32 %v869_v11, %v1000_v22  ;;  %v502_v17 = vpop.f32.mrb[7].mxu1 }
  0xf2   : > { %v558_v16 = vmul.f32 %v1000_v22, %v438_v12  ;;  %706 = vst.msk [vmem:[%s1024_s7 + $0x88] sm:$0xff] %vm688_vm3, %v673_v7  ;;  %v630_v18 = vmax.f32 %v598_v8, 0.0  ;;  %v612_v19 = vadd.f32 %v1005_v24, %v573_v9  ;;  %v599_v20 = vadd.f32 %v1005_v24, %v560_v10 }
  0xf3   : > { %v574_v21 = vmul.f32 %v1000_v22, %v502_v17  ;;  %v646_v23 = vmax.f32 %v614_v13, 0.0  ;;  %v628_v25 = vmax.f32 %v596_v14, 0.0  ;;  %v615_v26 = vadd.f32 %v1005_v24, %v576_v15 }
  0xf4   : > { %v597_v27 = vadd.f32 %v1005_v24, %v558_v16  ;;  %v662_v28 = vmin.f32 %v630_v18, 6.0  ;;  %v644_v29 = vmax.f32 %v612_v19, 0.0  ;;  %v631_v30 = vmax.f32 %v599_v20, 0.0 }
  0xf5   : > { %v613_v31 = vadd.f32 %v1005_v24, %v574_v21  ;;  %v678_v32 = vmin.f32 %v646_v23, 6.0  ;;  %v660_v33 = vmin.f32 %v628_v25, 6.0  ;;  %v647_v34 = vmax.f32 %v615_v26, 0.0  ;;  %v856_v36 = vpop.f32.mrb[8].mxu0 }
  0xf6   : > { %v629_v35 = vmax.f32 %v597_v27, 0.0  ;;  %695 = vst.msk [vmem:[%s1024_s7 + $0x30] sm:$0xff] %vm688_vm3, %v662_v28  ;;  %v676_v37 = vmin.f32 %v644_v29, 6.0  ;;  %v663_v38 = vmin.f32 %v631_v30, 6.0  ;;  %v563_v40 = vmul.f32 %v856_v36, %v1000_v22  ;;  %v872_v41 = vpop.f32.mrb[8].mxu1  ;;  %v451_v42 = vpop.f32.mrb[9].mxu0 }
  0xf7   : > { %v645_v39 = vmax.f32 %v613_v31, 0.0  ;;  %711 = vst.msk [vmem:[%s1024_s7 + $0xb0] sm:$0xff] %vm688_vm3, %v678_v32  ;;  %693 = vst.msk [vmem:[%s1024_s7 + $0x20] sm:$0xff] %vm688_vm3, %v660_v33  ;;  %v679_v43 = vmin.f32 %v647_v34, 6.0  ;;  %v579_v45 = vmul.f32 %v872_v41, %v1000_v22  ;;  %v561_v46 = vmul.f32 %v1000_v22, %v451_v42  ;;  %v515_v47 = vpop.f32.mrb[9].mxu1  ;;  %v857_v48 = vpop.f32.mrb[10].mxu0 }
  0xf8   : > { %v661_v44 = vmin.f32 %v629_v35, 6.0  ;;  %709 = vst.msk [vmem:[%s1024_s7 + $0xa0] sm:$0xff] %vm688_vm3, %v676_v37  ;;  %696 = vst.msk [vmem:[%s1024_s7 + $0x38] sm:$0xff] %vm688_vm3, %v663_v38  ;;  %v602_v50 = vadd.f32 %v1005_v24, %v563_v40  ;;  %v577_v51 = vmul.f32 %v1000_v22, %v515_v47  ;;  %v564_v52 = vmul.f32 %v857_v48, %v1000_v22  ;;  %v873_v53 = vpop.f32.mrb[10].mxu1  ;;  %v454_v54 = vpop.f32.mrb[11].mxu0 }
  0xf9   : > { %v677_v49 = vmin.f32 %v645_v39, 6.0  ;;  %712 = vst.msk [vmem:[%s1024_s7 + $0xb8] sm:$0xff] %vm688_vm3, %v679_v43  ;;  %v618_v55 = vadd.f32 %v1005_v24, %v579_v45  ;;  %v600_v56 = vadd.f32 %v1005_v24, %v561_v46  ;;  %v580_v57 = vmul.f32 %v873_v53, %v1000_v22  ;;  %v518_v59 = vpop.f32.mrb[11].mxu1 }
  0xfa   : > { %694 = vst.msk [vmem:[%s1024_s7 + $0x28] sm:$0xff] %vm688_vm3, %v661_v44  ;;  %v562_v58 = vmul.f32 %v1000_v22, %v454_v54  ;;  %v634_v60 = vmax.f32 %v602_v50, 0.0  ;;  %v616_v61 = vadd.f32 %v1005_v24, %v577_v51  ;;  %v603_v62 = vadd.f32 %v1005_v24, %v564_v52 }
  0xfb   : > { %710 = vst.msk [vmem:[%s1024_s7 + $0xa8] sm:$0xff] %vm688_vm3, %v677_v49  ;;  %v578_v63 = vmul.f32 %v1000_v22, %v518_v59  ;;  %v650_v0 = vmax.f32 %v618_v55, 0.0  ;;  %v632_v1 = vmax.f32 %v600_v56, 0.0  ;;  %v619_v2 = vadd.f32 %v1005_v24, %v580_v57 }
  0xfc   : > { %v601_v3 = vadd.f32 %v1005_v24, %v562_v58  ;;  %v666_v4 = vmin.f32 %v634_v60, 6.0  ;;  %v648_v5 = vmax.f32 %v616_v61, 0.0  ;;  %v635_v6 = vmax.f32 %v603_v62, 0.0 }
  0xfd   : > { %v617_v7 = vadd.f32 %v1005_v24, %v578_v63  ;;  %v682_v8 = vmin.f32 %v650_v0, 6.0  ;;  %v664_v9 = vmin.f32 %v632_v1, 6.0  ;;  %v651_v10 = vmax.f32 %v619_v2, 0.0  ;;  %v860_v12 = vpop.f32.mrb[12].mxu0 }
  0xfe   : > { %v633_v11 = vmax.f32 %v601_v3, 0.0  ;;  %699 = vst.msk [vmem:[%s1024_s7 + $0x50] sm:$0xff] %vm688_vm3, %v666_v4  ;;  %v680_v13 = vmin.f32 %v648_v5, 6.0  ;;  %v667_v14 = vmin.f32 %v635_v6, 6.0  ;;  %v567_v16 = vmul.f32 %v860_v12, %v1000_v22  ;;  %v876_v17 = vpop.f32.mrb[12].mxu1  ;;  %v467_v18 = vpop.f32.mrb[13].mxu0 }
  0xff   : > { %v649_v15 = vmax.f32 %v617_v7, 0.0  ;;  %715 = vst.msk [vmem:[%s1024_s7 + $0xd0] sm:$0xff] %vm688_vm3, %v682_v8  ;;  %697 = vst.msk [vmem:[%s1024_s7 + $0x40] sm:$0xff] %vm688_vm3, %v664_v9  ;;  %v683_v19 = vmin.f32 %v651_v10, 6.0  ;;  %v583_v21 = vmul.f32 %v876_v17, %v1000_v22  ;;  %v565_v23 = vmul.f32 %v1000_v22, %v467_v18  ;;  %v531_v25 = vpop.f32.mrb[13].mxu1  ;;  %v861_v26 = vpop.f32.mrb[14].mxu0 }
 0x100   : > { %v665_v20 = vmin.f32 %v633_v11, 6.0  ;;  %713 = vst.msk [vmem:[%s1024_s7 + $0xc0] sm:$0xff] %vm688_vm3, %v680_v13  ;;  %700 = vst.msk [vmem:[%s1024_s7 + $0x58] sm:$0xff] %vm688_vm3, %v667_v14  ;;  %v606_v28 = vadd.f32 %v1005_v24, %v567_v16  ;;  %v581_v29 = vmul.f32 %v1000_v22, %v531_v25  ;;  %v568_v30 = vmul.f32 %v861_v26, %v1000_v22  ;;  %v877_v31 = vpop.f32.mrb[14].mxu1  ;;  %v470_v32 = vpop.f32.mrb[15].mxu0 }
 0x101   : > { %v681_v27 = vmin.f32 %v649_v15, 6.0  ;;  %716 = vst.msk [vmem:[%s1024_s7 + $0xd8] sm:$0xff] %vm688_vm3, %v683_v19  ;;  %v622_v33 = vadd.f32 %v1005_v24, %v583_v21  ;;  %v604_v34 = vadd.f32 %v1005_v24, %v565_v23  ;;  %v584_v35 = vmul.f32 %v877_v31, %v1000_v22  ;;  %v534_v37 = vpop.f32.mrb[15].mxu1 }
 0x102   : > { %698 = vst.msk [vmem:[%s1024_s7 + $0x48] sm:$0xff] %vm688_vm3, %v665_v20  ;;  %v566_v36 = vmul.f32 %v1000_v22, %v470_v32  ;;  %v638_v38 = vmax.f32 %v606_v28, 0.0  ;;  %v620_v39 = vadd.f32 %v1005_v24, %v581_v29  ;;  %v607_v40 = vadd.f32 %v1005_v24, %v568_v30 }
 0x103   : > { %714 = vst.msk [vmem:[%s1024_s7 + $0xc8] sm:$0xff] %vm688_vm3, %v681_v27  ;;  %v582_v41 = vmul.f32 %v1000_v22, %v534_v37  ;;  %v654_v42 = vmax.f32 %v622_v33, 0.0  ;;  %v636_v43 = vmax.f32 %v604_v34, 0.0  ;;  %v623_v44 = vadd.f32 %v1005_v24, %v584_v35 }
 0x104   : > { %v605_v45 = vadd.f32 %v1005_v24, %v566_v36  ;;  %v670_v46 = vmin.f32 %v638_v38, 6.0  ;;  %v652_v47 = vmax.f32 %v620_v39, 0.0  ;;  %v639_v48 = vmax.f32 %v607_v40, 0.0 }
 0x105   : > { %v621_v49 = vadd.f32 %v1005_v24, %v582_v41  ;;  %v686_v50 = vmin.f32 %v654_v42, 6.0  ;;  %v668_v51 = vmin.f32 %v636_v43, 6.0  ;;  %v655_v22 = vmax.f32 %v623_v44, 0.0 }
 0x106   : > { %v637_v52 = vmax.f32 %v605_v45, 0.0  ;;  %703 = vst.msk [vmem:[%s1024_s7 + $0x70] sm:$0xff] %vm688_vm3, %v670_v46  ;;  %v684_v53 = vmin.f32 %v652_v47, 6.0  ;;  %v671_v54 = vmin.f32 %v639_v48, 6.0 }
 0x107   : > { %v653_v55 = vmax.f32 %v621_v49, 0.0  ;;  %719 = vst.msk [vmem:[%s1024_s7 + $0xf0] sm:$0xff] %vm688_vm3, %v686_v50  ;;  %701 = vst.msk [vmem:[%s1024_s7 + $0x60] sm:$0xff] %vm688_vm3, %v668_v51  ;;  %v687_v56 = vmin.f32 %v655_v22, 6.0 }
 0x108   : > { %v669_v57 = vmin.f32 %v637_v52, 6.0  ;;  %717 = vst.msk [vmem:[%s1024_s7 + $0xe0] sm:$0xff] %vm688_vm3, %v684_v53  ;;  %704 = vst.msk [vmem:[%s1024_s7 + $0x78] sm:$0xff] %vm688_vm3, %v671_v54 }
 0x109   : > { %v685_v24 = vmin.f32 %v653_v55, 6.0  ;;  %720 = vst.msk [vmem:[%s1024_s7 + $0xf8] sm:$0xff] %vm688_vm3, %v687_v56 }
 0x10a   : > { %702 = vst.msk [vmem:[%s1024_s7 + $0x68] sm:$0xff] %vm688_vm3, %v669_v57 }
 0x10b   : > { %718 = vst.msk [vmem:[%s1024_s7 + $0xe8] sm:$0xff] %vm688_vm3, %v685_v24 }
 0x10c PF: > { %s14_s15 = sadd.s32 1, %s915_s15  }
 0x10d   : > { %p11_p4 = scmp.ge.s32.totalorder %s14_s15, 4  }
 0x10f   :  { %13 = sbr.rel (!%p11_p4) target bundleno = 1 (0x1), region = 66 }

</bundles_post_ra>
